<compile_context>
chip_gen: v5e
topology: v5e:2x2
jax: 0.10.0
libtpu: 0.0.40
codegen_flags: <defaults>
</compile_context>

<pallas_src>
import jax
import jax.numpy as jnp
from jax.experimental import pallas as pl
from jax.experimental.pallas import tpu as pltpu


# ---------------------------------------------------------------------------
# Pallas kernel: fused 1x1-conv (channel matmul) + folded-BN bias add.
# ---------------------------------------------------------------------------
def _conv1x1_bn_kernel(w_ref, x_ref, b_ref, o_ref):
    # w_ref: (Cout, Cin)   BN-scale-folded conv weight (compute dtype, e.g. bf16)
    # x_ref: (Cin, T_HW)   one pixel tile of one image (compute dtype)
    # b_ref: (Cout, 1)     folded BN bias, f32 (broadcast along the lane axis)
    # o_ref: (Cout, T_HW)  f32 output tile (lane-dense along pixels)
    y = jnp.dot(w_ref[...], x_ref[...], preferred_element_type=jnp.float32)
    o_ref[...] = (y + b_ref[...]).astype(o_ref.dtype)


def _pick_hw_tile(hw, cin, cout, x_itemsize, out_itemsize=4,
                  vmem_budget_bytes=12 << 20):
    """Pixel-tile width: multiple of 128, or the full dim for small images."""
    if hw < 256:
        # Single full-width block (block dim == array dim is always layout-legal).
        return hw
    # Bytes per pixel column across the double-buffered x and out streams.
    per_col = 2 * cin * x_itemsize + 2 * cout * out_itemsize
    t_budget = max(128, (vmem_budget_bytes // max(per_col, 1)) // 128 * 128)
    # Aim for >= 2 pixel tiles so BlockSpec pipelining overlaps DMA with the MXU
    # (and v7x's two TensorCores can split the pixel axis at batch == 1).
    t_half = max(128, ((hw + 1) // 2) // 128 * 128)
    return int(min(t_budget, t_half))


def _make_conv_call(n, cin, cout, hw, t_hw, cost, single_buffer_consts):
    const_kw = {"pipeline_mode": pl.Buffered(1)} if single_buffer_consts else {}
    return pl.pallas_call(
        _conv1x1_bn_kernel,
        out_shape=jax.ShapeDtypeStruct((n, cout, hw), jnp.float32),
        grid_spec=pltpu.PrefetchScalarGridSpec(
            num_scalar_prefetch=0,
            grid=(n, pl.cdiv(hw, t_hw)),
            in_specs=[
                # Resident, grid-invariant weight (single-buffered).
                pl.BlockSpec((cout, cin), lambda i, j: (0, 0), **const_kw),
                # Per-(image, pixel-tile) activation block — double-buffered.
                pl.BlockSpec((None, cin, t_hw), lambda i, j: (i, 0, j)),
                # Resident, grid-invariant folded bias.
                pl.BlockSpec((cout, 1), lambda i, j: (0, 0), **const_kw),
            ],
            out_specs=pl.BlockSpec((None, cout, t_hw), lambda i, j: (i, 0, j)),
        ),
        compiler_params=pltpu.CompilerParams(
            dimension_semantics=("parallel", "parallel")),
        cost_estimate=cost,
    )


def conv1x1_bn_nchw(x_flat, w_scaled, bias, *, t_hw=None):
    """x_flat: (N, Cin, HW) in the compute dtype (bf16 recommended).
    w_scaled: (Cout, Cin) in the same compute dtype. bias: (Cout,) f32.

    Returns (N, Cout, HW) float32 = w_scaled @ x_flat[n] + bias  for each n.
    No dtype upcasts here — inputs reach the kernel at the caller's width, so a
    bf16 caller really does halve HBM read traffic.
    """
    n, cin, hw = x_flat.shape
    cout = w_scaled.shape[0]
    if t_hw is None:
        t_hw = _pick_hw_tile(hw, cin, cout, x_flat.dtype.itemsize)

    bias2 = bias.reshape(cout, 1).astype(jnp.float32)

    cost = pl.CostEstimate(
        flops=2 * n * cout * cin * hw,
        transcendentals=0,
        bytes_accessed=(x_flat.dtype.itemsize * n * cin * hw
                        + w_scaled.dtype.itemsize * cout * cin
                        + 4 * cout
                        + 4 * n * cout * hw),
    )

    try:
        call = _make_conv_call(n, cin, cout, hw, t_hw, cost, True)
        return call(w_scaled, x_flat, bias2)
    except Exception:  # noqa: BLE001
        # TODO(synk): this jax build rejected pipeline_mode=pl.Buffered(1) for the
        # grid-invariant weight/bias; fall back to default double-buffering.
        call = _make_conv_call(n, cin, cout, hw, t_hw, cost, False)
        return call(w_scaled, x_flat, bias2)


# ---------------------------------------------------------------------------
# AdjustLayer / AdjustAllLayer forward (glue in plain JAX, hot path in Pallas).
# ---------------------------------------------------------------------------
def adjust_layer_forward(x_nchw, params, *, use_pallas=None,
                         compute_dtype=jnp.bfloat16, t_hw=None):
    """x_nchw: (N, Cin, H, W). params: dict with conv weight + BN stats.

    Mirrors AdjustLayer.forward: returns (x_out, row_x).
    """
    n, cin, h, w = x_nchw.shape
    weight = params["weight"]          # (Cout, Cin) from PyTorch (Cout, Cin, 1, 1)
    cout = weight.shape[0]

    # Fold BN (inference form) into the conv in f32, then cast once.
    scale = params["gamma"] / jnp.sqrt(params["running_var"] + params["eps"])
    bias = params["beta"] - params["running_mean"] * scale          # f32
    w_scaled = weight.astype(jnp.float32) * scale[:, None]          # f32 fold

    if use_pallas is None:
        # Tiny channel counts under-utilize the MXU and the pallas_call fixed
        # cost dominates; production pysot shapes (Cin>=512, Cout=256) qualify.
        use_pallas = (cin >= 128 and cout >= 128)

    if use_pallas:
        # Free contiguous reshape NCHW -> (N, Cin, H*W); single cast to bf16
        # (no-op for a bf16 caller) halves HBM read bytes of this mem-bound op.
        x_flat = x_nchw.reshape(n, cin, h * w).astype(compute_dtype)
        y_flat = conv1x1_bn_nchw(x_flat, w_scaled.astype(compute_dtype), bias,
                                 t_hw=t_hw)                  # (N, Cout, H*W) f32
        y_nchw = y_flat.reshape(n, cout, h, w)               # free reshape back
    else:
        y_nchw = (jnp.einsum("nchw,oc->nohw", x_nchw.astype(jnp.float32),
                             w_scaled, preferred_element_type=jnp.float32)
                  + bias[None, :, None, None])

    if w < 20:
        row_x = y_nchw                      # un-cropped BN output
        l = 4
        r = l + 7
        # TODO(synk): emit the 7x7 crop as a second pallas output sliced from the
        # resident (Cout, T_HW) tile to save this (tiny) extra HBM re-read.
        x_out = y_nchw[:, :, l:r, l:r]      # center 7x7 crop
    else:
        # torch.tensor([0]) is int64; jax x64 is off by default -> int32 (cosmetic).
        row_x = jnp.zeros((1,), dtype=jnp.int32)
        x_out = y_nchw
    return x_out, row_x


def adjust_all_layer_forward(features, all_params, **kwargs):
    """AdjustAllLayer.forward.

    features: single array (num==1) or list of arrays (num>1), each NCHW.
    """
    num = len(all_params)
    if num == 1:
        return adjust_layer_forward(features, all_params[0], **kwargs)
    out, out_row = [], []
    for i in range(num):
        mix = adjust_layer_forward(features[i], all_params[i], **kwargs)
        out.append(mix[0])
        out_row.append(mix[1])
    return out, out_row


# ---------------------------------------------------------------------------
# Deterministic parameter init (synthetic; no checkpoint load).
# ---------------------------------------------------------------------------
def init_adjust_layer_params(key, in_channels, out_channels):
    k_w, k_g, k_b, k_m, k_v = jax.random.split(key, 5)
    return {
        "weight": 0.1 * jax.random.normal(
            k_w, (out_channels, in_channels), dtype=jnp.float32),
        "gamma": 1.0 + 0.05 * jax.random.normal(
            k_g, (out_channels,), dtype=jnp.float32),
        "beta": 0.05 * jax.random.normal(
            k_b, (out_channels,), dtype=jnp.float32),
        "running_mean": 0.01 * jax.random.normal(
            k_m, (out_channels,), dtype=jnp.float32),
        "running_var": jnp.abs(
            1.0 + 0.05 * jax.random.normal(
                k_v, (out_channels,), dtype=jnp.float32)),
        "eps": 1e-5,
    }


def _reference(x, p, compute_dtype=None):
    """Pure-JAX conv1x1+BN reference; optional input-precision matching."""
    scale = p["gamma"] / jnp.sqrt(p["running_var"] + p["eps"])
    bias = p["beta"] - p["running_mean"] * scale
    w_fold = p["weight"].astype(jnp.float32) * scale[:, None]
    if compute_dtype is not None:
        x = x.astype(compute_dtype)
        w_fold = w_fold.astype(compute_dtype)
    y = jnp.einsum("nchw,oc->nohw", x, w_fold,
                   preferred_element_type=jnp.float32)
    return y + bias[None, :, None, None]


if __name__ == "__main__":
    key = jax.random.PRNGKey(0)

    # AdjustAllLayer with num == 2 branches.
    #  branch 0: spatial 16 (<20) -> crop path, HW=256 -> two 128-wide pixel tiles
    #  branch 1: spatial 24 (>=20) -> no-crop path, HW=576 -> 256-wide tiles with
    #            a masked remainder tile (exercises the non-multiple-of-128 case)
    in_channels = [32, 64]
    out_channels = [16, 32]
    batch = 2
    spatials = [16, 24]

    keys = jax.random.split(key, 2 + len(in_channels))
    all_params = [
        init_adjust_layer_params(keys[2 + i], in_channels[i], out_channels[i])
        for i in range(len(in_channels))
    ]
    features = [
        jax.random.normal(keys[i],
                          (batch, in_channels[i], spatials[i], spatials[i]),
                          dtype=jnp.float32)
        for i in range(len(in_channels))
    ]

    # Force the Pallas path (the auto-heuristic would route these small synthetic
    # channel counts to the XLA einsum fallback).
    out, out_row = adjust_all_layer_forward(features, all_params,
                                            use_pallas=True)
    out = [jax.block_until_ready(o) for o in out]
    out_row = [jax.block_until_ready(r) for r in out_row]

    # --- branch 0: crop branch -------------------------------------------
    ref0_bf = _reference(features[0], all_params[0], jnp.bfloat16)  # matched prec
    ref0_f32 = _reference(features[0], all_params[0])               # true module
    assert out_row[0].shape == (batch, out_channels[0], 16, 16)
    assert out[0].shape == (batch, out_channels[0], 7, 7)
    assert out_row[0].dtype == jnp.float32
    assert jnp.allclose(out_row[0], ref0_bf, atol=1e-4, rtol=1e-4)
    assert jnp.allclose(out[0], ref0_bf[:, :, 4:11, 4:11], atol=1e-4, rtol=1e-4)
    assert jnp.allclose(out_row[0], ref0_f32, atol=1e-1, rtol=5e-2)  # bf16 inputs

    # --- branch 1: no-crop branch (row_x = tensor([0])) -------------------
    ref1_bf = _reference(features[1], all_params[1], jnp.bfloat16)
    ref1_f32 = _reference(features[1], all_params[1])
    assert out[1].shape == (batch, out_channels[1], 24, 24)
    assert out_row[1].shape == (1,)
    assert int(out_row[1][0]) == 0
    assert jnp.allclose(out[1], ref1_bf, atol=1e-4, rtol=1e-4)
    assert jnp.allclose(out[1], ref1_f32, atol=1e-1, rtol=5e-2)

    print("KERNEL_OK")
</pallas_src>

<mosaic_0001>
module attributes {stable_mosaic.version = 11 : i64} {
  func.func @_conv1x1_bn_kernel(%arg0: i32, %arg1: i32, %arg2: memref<16x32xbf16, #tpu.memory_space<vmem>>, %arg3: memref<1x32x128xbf16, #tpu.memory_space<vmem>>, %arg4: memref<16x1xf32, #tpu.memory_space<vmem>>, %arg5: memref<1x16x128xf32, #tpu.memory_space<vmem>>) attributes {dimension_semantics = [#tpu.dimension_semantics<parallel>, #tpu.dimension_semantics<parallel>], iteration_bounds = array<i64: 2, 2>, scalar_prefetch = 0 : i64, scratch_operands = 0 : i64, tpu.core_type = #tpu.core_type<tc>, window_params = [{pipeline_mode = #tpu.pipeline_mode<synchronous>, transform_indices = @transform_0, window_bounds = array<i64: 16, 32>}, {transform_indices = @transform_1, window_bounds = array<i64: 1, 32, 128>}, {pipeline_mode = #tpu.pipeline_mode<synchronous>, transform_indices = @transform_2, window_bounds = array<i64: 16, 1>}, {transform_indices = @transform_3, window_bounds = array<i64: 1, 16, 128>}]} {
    %c0 = arith.constant 0 : index
    %c0_0 = arith.constant 0 : index
    %0 = vector.load %arg2[%c0, %c0_0] : memref<16x32xbf16, #tpu.memory_space<vmem>>, vector<16x32xbf16>
    %c0_1 = arith.constant 0 : index
    %c0_2 = arith.constant 0 : index
    %c0_3 = arith.constant 0 : index
    %1 = vector.load %arg3[%c0_1, %c0_2, %c0_3] : memref<1x32x128xbf16, #tpu.memory_space<vmem>>, vector<1x32x128xbf16>
    %2 = vector.shape_cast %1 : vector<1x32x128xbf16> to vector<32x128xbf16>
    %cst = arith.constant dense<0.000000e+00> : vector<16x128xf32>
    %3 = tpu.matmul %0, %2, %cst {dimension_numbers = #tpu.dot_dimension_numbers<[1], [0], [0], [1], [0, 0, 1, 1], [], []>} : vector<16x32xbf16>, vector<32x128xbf16>, vector<16x128xf32> -> vector<16x128xf32>
    %c0_4 = arith.constant 0 : index
    %c0_5 = arith.constant 0 : index
    %4 = vector.load %arg4[%c0_4, %c0_5] : memref<16x1xf32, #tpu.memory_space<vmem>>, vector<16x1xf32>
    %5 = vector.broadcast %4 : vector<16x1xf32> to vector<16x128xf32>
    %6 = arith.addf %3, %5 : vector<16x128xf32>
    %c0_6 = arith.constant 0 : index
    %c0_7 = arith.constant 0 : index
    %c0_8 = arith.constant 0 : index
    %7 = vector.load %arg5[%c0_6, %c0_7, %c0_8] : memref<1x16x128xf32, #tpu.memory_space<vmem>>, vector<1x16x128xf32>
    %8 = vector.shape_cast %7 : vector<1x16x128xf32> to vector<16x128xf32>
    %9 = vector.shape_cast %6 : vector<16x128xf32> to vector<1x16x128xf32>
    tpu.vector_store %arg5[%c0_6, %c0_7, %c0_8], %9 {strides = array<i32>} : memref<1x16x128xf32, #tpu.memory_space<vmem>>, vector<1x16x128xf32>,
    return
  }
  func.func @transform_0(%arg0: i32, %arg1: i32) -> (i32, i32) {
    %c0_i32 = arith.constant 0 : i32
    %c0_i32_0 = arith.constant 0 : i32
    %c0_i32_1 = arith.constant 0 : i32
    return %c0_i32, %c0_i32_0 : i32, i32
  }
  func.func @transform_1(%arg0: i32, %arg1: i32) -> (i32, i32, i32) {
    %c0_i32 = arith.constant 0 : i32
    %c0_i32_0 = arith.constant 0 : i32
    return %arg0, %c0_i32, %arg1 : i32, i32, i32
  }
  func.func @transform_2(%arg0: i32, %arg1: i32) -> (i32, i32) {
    %c0_i32 = arith.constant 0 : i32
    %c0_i32_0 = arith.constant 0 : i32
    %c0_i32_1 = arith.constant 0 : i32
    return %c0_i32, %c0_i32_0 : i32, i32
  }
  func.func @transform_3(%arg0: i32, %arg1: i32) -> (i32, i32, i32) {
    %c0_i32 = arith.constant 0 : i32
    %c0_i32_0 = arith.constant 0 : i32
    return %arg0, %c0_i32, %arg1 : i32, i32, i32
  }
}

module attributes {stable_mosaic.version = 11 : i64} {
  func.func @_conv1x1_bn_kernel(%arg0: i32, %arg1: i32, %arg2: memref<16x32xbf16, #tpu.memory_space<vmem>>, %arg3: memref<1x32x128xbf16, #tpu.memory_space<vmem>>, %arg4: memref<16x1xf32, #tpu.memory_space<vmem>>, %arg5: memref<1x16x128xf32, #tpu.memory_space<vmem>>) attributes {dimension_semantics = [#tpu.dimension_semantics<parallel>, #tpu.dimension_semantics<parallel>], iteration_bounds = array<i64: 2, 2>, scalar_prefetch = 0 : i64, scratch_operands = 0 : i64, tpu.core_type = #tpu.core_type<tc>, window_params = [{pipeline_mode = #tpu.pipeline_mode<synchronous>, transform_indices = @transform_0, window_bounds = array<i64: 16, 32>}, {transform_indices = @transform_1, window_bounds = array<i64: 1, 32, 128>}, {pipeline_mode = #tpu.pipeline_mode<synchronous>, transform_indices = @transform_2, window_bounds = array<i64: 16, 1>}, {transform_indices = @transform_3, window_bounds = array<i64: 1, 16, 128>}]} {
    %c0 = arith.constant 0 : index
    %c0_0 = arith.constant 0 : index
    %0 = vector.load %arg2[%c0, %c0_0] : memref<16x32xbf16, #tpu.memory_space<vmem>>, vector<16x32xbf16>
    %c0_1 = arith.constant 0 : index
    %c0_2 = arith.constant 0 : index
    %c0_3 = arith.constant 0 : index
    %1 = vector.load %arg3[%c0_1, %c0_2, %c0_3] : memref<1x32x128xbf16, #tpu.memory_space<vmem>>, vector<1x32x128xbf16>
    %2 = vector.shape_cast %1 : vector<1x32x128xbf16> to vector<32x128xbf16>
    %cst = arith.constant dense<0.000000e+00> : vector<16x128xf32>
    %3 = tpu.matmul %0, %2, %cst {dimension_numbers = #tpu.dot_dimension_numbers<[1], [0], [0], [1], [0, 0, 1, 1], [], []>} : vector<16x32xbf16>, vector<32x128xbf16>, vector<16x128xf32> -> vector<16x128xf32>
    %c0_4 = arith.constant 0 : index
    %c0_5 = arith.constant 0 : index
    %4 = vector.load %arg4[%c0_4, %c0_5] : memref<16x1xf32, #tpu.memory_space<vmem>>, vector<16x1xf32>
    %5 = vector.broadcast %4 : vector<16x1xf32> to vector<16x128xf32>
    %6 = arith.addf %3, %5 : vector<16x128xf32>
    %c0_6 = arith.constant 0 : index
    %c0_7 = arith.constant 0 : index
    %c0_8 = arith.constant 0 : index
    %7 = vector.load %arg5[%c0_6, %c0_7, %c0_8] : memref<1x16x128xf32, #tpu.memory_space<vmem>>, vector<1x16x128xf32>
    %8 = vector.shape_cast %7 : vector<1x16x128xf32> to vector<16x128xf32>
    %9 = vector.shape_cast %6 : vector<16x128xf32> to vector<1x16x128xf32>
    tpu.vector_store %arg5[%c0_6, %c0_7, %c0_8], %9 {strides = array<i32>} : memref<1x16x128xf32, #tpu.memory_space<vmem>>, vector<1x16x128xf32>,
    return
  }
  func.func @transform_0(%arg0: i32, %arg1: i32) -> (i32, i32) {
    %c0_i32 = arith.constant 0 : i32
    %c0_i32_0 = arith.constant 0 : i32
    %c0_i32_1 = arith.constant 0 : i32
    return %c0_i32, %c0_i32_0 : i32, i32
  }
  func.func @transform_1(%arg0: i32, %arg1: i32) -> (i32, i32, i32) {
    %c0_i32 = arith.constant 0 : i32
    %c0_i32_0 = arith.constant 0 : i32
    return %arg0, %c0_i32, %arg1 : i32, i32, i32
  }
  func.func @transform_2(%arg0: i32, %arg1: i32) -> (i32, i32) {
    %c0_i32 = arith.constant 0 : i32
    %c0_i32_0 = arith.constant 0 : i32
    %c0_i32_1 = arith.constant 0 : i32
    return %c0_i32, %c0_i32_0 : i32, i32
  }
  func.func @transform_3(%arg0: i32, %arg1: i32) -> (i32, i32, i32) {
    %c0_i32 = arith.constant 0 : i32
    %c0_i32_0 = arith.constant 0 : i32
    return %arg0, %c0_i32, %arg1 : i32, i32, i32
  }
}

</mosaic_0001>

<bundles_post_ra>
// kernel: tpu_custom_call.1
= control target key start
LH: loop header
LB: loop body
LE: loop exit
PB: predicated region body
PF: predicated region fallthrough
CT: control target
= control target key end

     0   :  { %8 = vsyncpa [#allocation3], 0  ;;  %s794_s0 = inlined_call_operand.vmem [shape: bf16[16,32], index: 0, kind: input, shape index: {}]   ;;  %s795_s1 = inlined_call_operand.hbm [shape: bf16[2,32,256], index: 1, kind: input, shape index: {}]   ;;  %s796_s2 = inlined_call_operand.vmem [shape: f32[16,1], index: 2, kind: input, shape index: {}]   ;;  %s797_s3 = inlined_call_operand.hbm [shape: f32[2,16,256], index: 3, kind: output, shape index: {}]  }
   0x1   :  { %10 = vsyncpa [#allocation3 + $0x1], 0 }
   0x2   :  { %11 = vsyncpa [#allocation4], 0 }
   0x3   :  { %13 = vsyncpa [#allocation4 + $0x1], 0  ;;  %s643_s12 = smov 0   ;;  %s645_s13 = smov 0  }
   0x4   :  { %s647_s14 = smov 0   ;;  %s649_s15 = smov 0  }
   0x5   :  { %s651_s16 = smov 0   ;;  %s653_s17 = smov 0  }
   0x6   :  { %s655_s18 = smov 0   ;;  %s657_s19 = smov 0  }
   0x7 LB: > { %s369_s20 = sadd.s32 4294967295, %s614_s19   ;;  %s370_s21 = sadd.s32 4294967294, %s614_s19   ;;  %s614_s19 = sphi %s657_s19, %s19_s19   ;;  %s610_s18 = sphi %s655_s18, %s816_s18   ;;  %s606_s17 = sphi %s653_s17, %s815_s17   ;;  %s602_s16 = sphi %s651_s16, %s814_s16   ;;  %s598_s15 = sphi %s649_s15, %s813_s15   ;;  %s594_s14 = sphi %s647_s14, %s812_s14   ;;  %s590_s13 = sphi %s645_s13, %s811_s13   ;;  %s586_s12 = sphi %s643_s12, %s810_s12  }
   0x8   : > { %s28_s22 = sadd.s32 1, %s606_s17  ;;  %s31_s23 = sadd.s32 1, %s610_s18 }
   0x9   : > { %p29_p0 = scmp.ge.s32.totalorder %s28_s22, 2  ;;  %s61_s24 = sadd.s32 1, %s594_s14 }
   0xa   : > { %p68_p1 = scmp.ne.s32.totalorder %s594_s14, %s590_s13  ;;  %p69_p2 = scmp.eq.s32.totalorder %s614_s19, 0 }
   0xb   : > { %s818_s22 = smov (%p29_p0, %s28_s22), 0  ;;  %s820_s23 = smov (!%p29_p0, %s31_s23), %s610_s18 }
   0xc   : > { %800 = sst [smem:[#allocation8_spill]] %s818_s22  ;;  %s57_s25 = ssub.s32 %s606_s17, %s818_s22 }
   0xd   : > { %p696_p3 = por %p69_p2, %p68_p1  ;;  %p33_p4 = scmp.ge.s32.totalorder %s820_s23, 2 }
   0xe   : > { %p74_p5 = scmp.ne.s32.totalorder %s590_s13, %s586_s12  ;;  %p75_p6 = scmp.eq.s32.totalorder %s369_s20, 0 }
   0xf   : > { %p121_p7 = scmp.eq.s32.totalorder %s369_s20, 3  ;;  %s822_s23 = smov (%p33_p4, %s820_s23), 0 }
  0x10   : > { %802 = sst [smem:[#allocation9_spill]] %s822_s23  ;;  %p704_p8 = por %p75_p6, %p74_p5 }
  0x11   : > { %p708_p9 = por %p121_p7, %p68_p1  ;;  %s56_s29 = ssub.s32 %s610_s18, %s822_s23 }
  0x12   : > { %p127_p10 = scmp.eq.s32.totalorder %s370_s21, 3  ;;  %s58_s30 = sor.u32 %s57_s25, %s56_s29 }
  0x13   : > { %p59_p11 = scmp.eq.s32.totalorder %s58_s30, 0  ;;  %p412_p13 = scmp.lt.s32.totalorder %s614_s19, 4 }
  0x14   : > { %p714_p12 = por %p127_p10, %p74_p5  ;;  %s153_s5 = sand.u32 1, %s594_s14  }
  0x15   : > { %s721_s6 = scalar_select %p59_p11, %s594_s14, %s61_s24  }
  0x16   : > { %s373_s7 = sshll.u32 %s153_s5, 4  ;;  %s374_s8 = sshll.u32 %s610_s18, 3 }
  0x17   : > { %806 = sst [smem:[#allocation10_spill]] %s721_s6  ;;  %s161_s9 = sadd.s32 %s606_s17, %s374_s8 }
  0x18   : > { %s157_s10 = scalar_lea.vmem [#allocation2], %s373_s7  ;;  %s375_s20 = sshll.u32 %s161_s9, 2 }
  0x19   : > { %s166_s11 = sshll.u32 %s157_s10, 4  ;;  %s163_s29 = scalar_lea.hbm %s795_s1, %s375_s20  ;;  %s167_s11 = int_to_ptr.vmem [resolvable:$true] %s166_s11 }
  0x1a   : > { %p405_p0 = pnand %p412_p13, %p696_p3  ;;  %s164_s30 = sshll.u32 %s163_s29, 4  ;;  %s165_s30 = int_to_ptr.hbm [resolvable:$true] %s164_s30 }
  0x1b   : > { %s154_s23 = scalar_lea.sflag [#allocation3], %s153_s5  ;;  %s616_s24 = smov 128  }
  0x1c   : > { %s617_s22 = smov 64   ;;  %s618_s6 = smov 4  }
  0x1d   : > { %407 = dma.hbm_to_vmem [thread:$0]  (!%p405_p0), %s165_s30, 256, %s167_s11, %s154_s23, %s616_s24, %s617_s22, %s618_s6  }
  0x1e   : > { %p376_p1 = scmp.ge.s32.totalorder %s614_s19, 1  ;;  %p174_p2 = scmp.lt.s32.totalorder %s614_s19, 5 }
  0x20   : > { %p175_p4 = pnand %p376_p1, %p174_p2 }
  0x21   : > { %s733_s7 = sand.u32 (!%p175_p4), 1, %s590_s13  }
  0x22   : > { %178 = sbr.rel (%p175_p4) target bundleno = 189 (0xbd), region = 32  ;;  %s377_s8 = sshll.u32 (!%p175_p4), %s733_s7, 4 }
  0x23   : > { %s181_s26 = scalar_lea.sflag (!%p175_p4), [#allocation3], %s733_s7  ;;  %s184_s9 = scalar_lea.vmem (!%p175_p4), [#allocation2], %s377_s8 }
  0x27   : > { %577 = dma.done.wait (%p704_p8), %s181_s26, 256  }
  0x28   : > { %579 = vsyncadd (%p704_p8), %s181_s26, 4294967040  ;;  %v619_v0 = vmov 0   ;;  %v399_v1 = vld [vmem:[%s184_s9 + $0x8] sm:$0xff]  ;;  %v215_v2 = vld [vmem:[%s796_s2] sm:$0xff]  ;;  %vm244_vm0 = vcmask 261120   ;;  %s393_s11 = sshll.u32 %s602_s16, 2 }
  0x29   : > { %485 = vset.pattern.permute.xlu0 %v619_v0  ;;  %254 = vmatpush.bf16.msra.mxu0 %v399_v1  ;;  %v398_v3 = vld [vmem:[%s184_s9] sm:$0xff]  ;;  %v216_v5 = vld [vmem:[%s796_s2 + $0x8] sm:$0xff]  ;;  %s275_s20 = sadd.s32 %s598_s15, %s393_s11  ;;  %s207_s24 = scalar_lea.vmem [#allocation5], %s377_s8 }
  0x2a   : > { %219 = vperm.xlu0 %485, %v215_v2   ;;  %v397_v4 = vld [vmem:[%s794_s0] sm:$0xff]  ;;  %s394_s21 = sshll.u32 %s275_s20, 3  ;;  %s278_s26 = sshll.u32 %s207_s24, 4  ;;  %s279_s26 = int_to_ptr.vmem [resolvable:$true] %s278_s26 }
  0x2b   : > { %s277_s30 = scalar_lea.hbm %s797_s3, %s394_s21  ;;  %s265_s15 = scalar_lea.sflag [#allocation4], %s733_s7 }
  0x2c   : > { %s280_s9 = sshll.u32 %s277_s30, 4  ;;  %s536_s8 = scalar_lea.hbm %s797_s3, 64  ;;  %s281_s9 = int_to_ptr.hbm [resolvable:$true] %s280_s9 }
  0x2d   : > { %255 = vmatpush.bf16.msra.mxu0 %v398_v3  ;;  %s530_s16 = sshra.s32 %s281_s9, 4  ;;  %s531_s16 = int_to_ptr.hbm [resolvable:$true] %s530_s16 }
  0x2e   : > { %s532_s22 = scalar_lea.hbm %s531_s16, 16  ;;  %p537_p7 = scmp.lt.s32.totalorder %s531_s16, %s797_s3 }
  0x2f   : > { %p533_p3 = scmp.ne.s32.totalorder %s531_s16, %s532_s22  ;;  %p538_p8 = scmp.lt.s32.totalorder %s536_s8, %s532_s22 }
  0x30   : > { %391 = vmatmul.msk.bf16.vlgmr.msra.gmra.mxu0 %vm244_vm0, %v397_v4 }
  0x31   : > { %p534_p5 = pnand %p533_p3, %p708_p9  ;;  %p539_p10 = por %p538_p8, %p537_p7 }
  0x32   : > { %224 = vperm.xlu0 %485, %v216_v5  }
  0x33   : > { %p535_p6 = pneg %p534_p5 }
  0x35   : > { %p540_p11 = pnand %p539_p10, %p535_p6 }
  0x9c   : > { %v220_v6 = vpop.permute.xlu0 %219 }
  0xa4   : > { %v225_v9 = vpop.permute.xlu0 %224 }
  0xad   : > { %v257_v7 = vpop.f32.mrf.mxu0 }
  0xae   : > { %v258_v8 = vadd.f32 %v257_v7, %v220_v6 }
  0xb0   : > { %262 = vst [vmem:[%s207_s24] sm:$0xff] %v258_v8 }
  0xb5   : > { %v259_v10 = vpop.f32.mrf.mxu0 }
  0xb6   : > { %v260_v11 = vadd.f32 %v259_v10, %v225_v9 }
  0xb8   : > { %263 = vst [vmem:[%s207_s24 + $0x8] sm:$0xff] %v260_v11 }
  0xb9   : > { %543 = shalt.err (!%p540_p11)
}
  0xba   : > { %s620_s7 = smov 128   ;;  %s621_s10 = smov 256  }
  0xbb   : > { %s622_s11 = smov 8  }
  0xbc   : > { %402 = dma.vmem_to_hbm [thread:$0]  (%p708_p9), %s279_s26, 256, %s281_s9, %s265_s15, %s620_s7, %s621_s10, %s622_s11  }
  0xbd PF: > { %p413_p13 = scmp.ge.s32.totalorder %s614_s19, 2  ;;  %s295_s20 = sand.u32 1, %s586_s12  }
  0xbe   : > { %s296_s21 = scalar_lea.sflag [#allocation4], %s295_s20 }
  0xbf   : > { %p409_p0 = pnand %p413_p13, %p714_p12 }
  0xc1   : > { %p410_p1 = pneg %p409_p0 }
  0xc3   : > { %581 = dma.done.wait (%p410_p1), %s296_s21, 256  }
  0xc4   : > { %583 = vsyncadd (%p410_p1), %s296_s21, 4294967040  ;;  %s19_s19 = sadd.s32 1, %s614_s19   ;;  %s807_s25 = sld [smem:[#allocation10_spill]] }
  0xc5   : > { %p16_p2 = scmp.ge.s32.totalorder %s19_s19, 6   ;;  %s808_s28 = sld [smem:[#allocation8_spill]] }
  0xc6   : > { %s809_s29 = sld [smem:[#allocation9_spill]]  ;;  %s810_s12 = smov %s590_s13 }
  0xc7   : > { %s811_s13 = smov %s594_s14  ;;  %s813_s15 = smov %s606_s17 }
  0xc8   : > { %s814_s16 = smov %s610_s18  ;;  %18 = sbr.rel (!%p16_p2) target bundleno = 7 (0x7), region = 77 }
  0xca   : > { %s812_s14 = smov %s807_s25 }
  0xcb   : > { %s815_s17 = smov %s808_s28 }
  0xcc   : > { %s816_s18 = smov %s809_s29 }
  0xcd   :  { %302 = vsyncpa [#allocation3], 1 }
  0xce   :  { %304 = vsyncpa [#allocation3 + $0x1], 1 }
  0xcf   :  { %305 = vsyncpa [#allocation4], 1 }
  0xd0   :  { %307 = vsyncpa [#allocation4 + $0x1], 1 }

// kernel: tpu_custom_call.1
= control target key start
LH: loop header
LB: loop body
LE: loop exit
PB: predicated region body
PF: predicated region fallthrough
CT: control target
= control target key end

     0   :  { %8 = vsyncpa [#allocation3], 0  ;;  %s794_s0 = inlined_call_operand.vmem [shape: bf16[16,32], index: 0, kind: input, shape index: {}]   ;;  %s795_s1 = inlined_call_operand.hbm [shape: bf16[2,32,256], index: 1, kind: input, shape index: {}]   ;;  %s796_s2 = inlined_call_operand.vmem [shape: f32[16,1], index: 2, kind: input, shape index: {}]   ;;  %s797_s3 = inlined_call_operand.hbm [shape: f32[2,16,256], index: 3, kind: output, shape index: {}]  }
   0x1   :  { %10 = vsyncpa [#allocation3 + $0x1], 0 }
   0x2   :  { %11 = vsyncpa [#allocation4], 0 }
   0x3   :  { %13 = vsyncpa [#allocation4 + $0x1], 0  ;;  %s643_s12 = smov 0   ;;  %s645_s13 = smov 0  }
   0x4   :  { %s647_s14 = smov 0   ;;  %s649_s15 = smov 0  }
   0x5   :  { %s651_s16 = smov 0   ;;  %s653_s17 = smov 0  }
   0x6   :  { %s655_s18 = smov 0   ;;  %s657_s19 = smov 0  }
   0x7 LB: > { %s369_s20 = sadd.s32 4294967295, %s614_s19   ;;  %s370_s21 = sadd.s32 4294967294, %s614_s19   ;;  %s614_s19 = sphi %s657_s19, %s19_s19   ;;  %s610_s18 = sphi %s655_s18, %s816_s18   ;;  %s606_s17 = sphi %s653_s17, %s815_s17   ;;  %s602_s16 = sphi %s651_s16, %s814_s16   ;;  %s598_s15 = sphi %s649_s15, %s813_s15   ;;  %s594_s14 = sphi %s647_s14, %s812_s14   ;;  %s590_s13 = sphi %s645_s13, %s811_s13   ;;  %s586_s12 = sphi %s643_s12, %s810_s12  }
   0x8   : > { %s28_s22 = sadd.s32 1, %s606_s17  ;;  %s31_s23 = sadd.s32 1, %s610_s18 }
   0x9   : > { %p29_p0 = scmp.ge.s32.totalorder %s28_s22, 2  ;;  %s61_s24 = sadd.s32 1, %s594_s14 }
   0xa   : > { %p68_p1 = scmp.ne.s32.totalorder %s594_s14, %s590_s13  ;;  %p69_p2 = scmp.eq.s32.totalorder %s614_s19, 0 }
   0xb   : > { %s818_s22 = smov (%p29_p0, %s28_s22), 0  ;;  %s820_s23 = smov (!%p29_p0, %s31_s23), %s610_s18 }
   0xc   : > { %800 = sst [smem:[#allocation8_spill]] %s818_s22  ;;  %s57_s25 = ssub.s32 %s606_s17, %s818_s22 }
   0xd   : > { %p696_p3 = por %p69_p2, %p68_p1  ;;  %p33_p4 = scmp.ge.s32.totalorder %s820_s23, 2 }
   0xe   : > { %p74_p5 = scmp.ne.s32.totalorder %s590_s13, %s586_s12  ;;  %p75_p6 = scmp.eq.s32.totalorder %s369_s20, 0 }
   0xf   : > { %p121_p7 = scmp.eq.s32.totalorder %s369_s20, 3  ;;  %s822_s23 = smov (%p33_p4, %s820_s23), 0 }
  0x10   : > { %802 = sst [smem:[#allocation9_spill]] %s822_s23  ;;  %p704_p8 = por %p75_p6, %p74_p5 }
  0x11   : > { %p708_p9 = por %p121_p7, %p68_p1  ;;  %s56_s29 = ssub.s32 %s610_s18, %s822_s23 }
  0x12   : > { %p127_p10 = scmp.eq.s32.totalorder %s370_s21, 3  ;;  %s58_s30 = sor.u32 %s57_s25, %s56_s29 }
  0x13   : > { %p59_p11 = scmp.eq.s32.totalorder %s58_s30, 0  ;;  %p412_p13 = scmp.lt.s32.totalorder %s614_s19, 4 }
  0x14   : > { %p714_p12 = por %p127_p10, %p74_p5  ;;  %s153_s5 = sand.u32 1, %s594_s14  }
  0x15   : > { %s721_s6 = scalar_select %p59_p11, %s594_s14, %s61_s24  }
  0x16   : > { %s373_s7 = sshll.u32 %s153_s5, 4  ;;  %s374_s8 = sshll.u32 %s610_s18, 3 }
  0x17   : > { %806 = sst [smem:[#allocation10_spill]] %s721_s6  ;;  %s161_s9 = sadd.s32 %s606_s17, %s374_s8 }
  0x18   : > { %s157_s10 = scalar_lea.vmem [#allocation2], %s373_s7  ;;  %s375_s20 = sshll.u32 %s161_s9, 2 }
  0x19   : > { %s166_s11 = sshll.u32 %s157_s10, 4  ;;  %s163_s29 = scalar_lea.hbm %s795_s1, %s375_s20  ;;  %s167_s11 = int_to_ptr.vmem [resolvable:$true] %s166_s11 }
  0x1a   : > { %p405_p0 = pnand %p412_p13, %p696_p3  ;;  %s164_s30 = sshll.u32 %s163_s29, 4  ;;  %s165_s30 = int_to_ptr.hbm [resolvable:$true] %s164_s30 }
  0x1b   : > { %s154_s23 = scalar_lea.sflag [#allocation3], %s153_s5  ;;  %s616_s24 = smov 128  }
  0x1c   : > { %s617_s22 = smov 64   ;;  %s618_s6 = smov 4  }
  0x1d   : > { %407 = dma.hbm_to_vmem [thread:$0]  (!%p405_p0), %s165_s30, 256, %s167_s11, %s154_s23, %s616_s24, %s617_s22, %s618_s6  }
  0x1e   : > { %p376_p1 = scmp.ge.s32.totalorder %s614_s19, 1  ;;  %p174_p2 = scmp.lt.s32.totalorder %s614_s19, 5 }
  0x20   : > { %p175_p4 = pnand %p376_p1, %p174_p2 }
  0x21   : > { %s733_s7 = sand.u32 (!%p175_p4), 1, %s590_s13  }
  0x22   : > { %178 = sbr.rel (%p175_p4) target bundleno = 189 (0xbd), region = 32  ;;  %s377_s8 = sshll.u32 (!%p175_p4), %s733_s7, 4 }
  0x23   : > { %s181_s26 = scalar_lea.sflag (!%p175_p4), [#allocation3], %s733_s7  ;;  %s184_s9 = scalar_lea.vmem (!%p175_p4), [#allocation2], %s377_s8 }
  0x27   : > { %577 = dma.done.wait (%p704_p8), %s181_s26, 256  }
  0x28   : > { %579 = vsyncadd (%p704_p8), %s181_s26, 4294967040  ;;  %v619_v0 = vmov 0   ;;  %v399_v1 = vld [vmem:[%s184_s9 + $0x8] sm:$0xff]  ;;  %v215_v2 = vld [vmem:[%s796_s2] sm:$0xff]  ;;  %vm244_vm0 = vcmask 261120   ;;  %s393_s11 = sshll.u32 %s602_s16, 2 }
  0x29   : > { %485 = vset.pattern.permute.xlu0 %v619_v0  ;;  %254 = vmatpush.bf16.msra.mxu0 %v399_v1  ;;  %v398_v3 = vld [vmem:[%s184_s9] sm:$0xff]  ;;  %v216_v5 = vld [vmem:[%s796_s2 + $0x8] sm:$0xff]  ;;  %s275_s20 = sadd.s32 %s598_s15, %s393_s11  ;;  %s207_s24 = scalar_lea.vmem [#allocation5], %s377_s8 }
  0x2a   : > { %219 = vperm.xlu0 %485, %v215_v2   ;;  %v397_v4 = vld [vmem:[%s794_s0] sm:$0xff]  ;;  %s394_s21 = sshll.u32 %s275_s20, 3  ;;  %s278_s26 = sshll.u32 %s207_s24, 4  ;;  %s279_s26 = int_to_ptr.vmem [resolvable:$true] %s278_s26 }
  0x2b   : > { %s277_s30 = scalar_lea.hbm %s797_s3, %s394_s21  ;;  %s265_s15 = scalar_lea.sflag [#allocation4], %s733_s7 }
  0x2c   : > { %s280_s9 = sshll.u32 %s277_s30, 4  ;;  %s536_s8 = scalar_lea.hbm %s797_s3, 64  ;;  %s281_s9 = int_to_ptr.hbm [resolvable:$true] %s280_s9 }
  0x2d   : > { %255 = vmatpush.bf16.msra.mxu0 %v398_v3  ;;  %s530_s16 = sshra.s32 %s281_s9, 4  ;;  %s531_s16 = int_to_ptr.hbm [resolvable:$true] %s530_s16 }
  0x2e   : > { %s532_s22 = scalar_lea.hbm %s531_s16, 16  ;;  %p537_p7 = scmp.lt.s32.totalorder %s531_s16, %s797_s3 }
  0x2f   : > { %p533_p3 = scmp.ne.s32.totalorder %s531_s16, %s532_s22  ;;  %p538_p8 = scmp.lt.s32.totalorder %s536_s8, %s532_s22 }
  0x30   : > { %391 = vmatmul.msk.bf16.vlgmr.msra.gmra.mxu0 %vm244_vm0, %v397_v4 }
  0x31   : > { %p534_p5 = pnand %p533_p3, %p708_p9  ;;  %p539_p10 = por %p538_p8, %p537_p7 }
  0x32   : > { %224 = vperm.xlu0 %485, %v216_v5  }
  0x33   : > { %p535_p6 = pneg %p534_p5 }
  0x35   : > { %p540_p11 = pnand %p539_p10, %p535_p6 }
  0x9c   : > { %v220_v6 = vpop.permute.xlu0 %219 }
  0xa4   : > { %v225_v9 = vpop.permute.xlu0 %224 }
  0xad   : > { %v257_v7 = vpop.f32.mrf.mxu0 }
  0xae   : > { %v258_v8 = vadd.f32 %v257_v7, %v220_v6 }
  0xb0   : > { %262 = vst [vmem:[%s207_s24] sm:$0xff] %v258_v8 }
  0xb5   : > { %v259_v10 = vpop.f32.mrf.mxu0 }
  0xb6   : > { %v260_v11 = vadd.f32 %v259_v10, %v225_v9 }
  0xb8   : > { %263 = vst [vmem:[%s207_s24 + $0x8] sm:$0xff] %v260_v11 }
  0xb9   : > { %543 = shalt.err (!%p540_p11)
}
  0xba   : > { %s620_s7 = smov 128   ;;  %s621_s10 = smov 256  }
  0xbb   : > { %s622_s11 = smov 8  }
  0xbc   : > { %402 = dma.vmem_to_hbm [thread:$0]  (%p708_p9), %s279_s26, 256, %s281_s9, %s265_s15, %s620_s7, %s621_s10, %s622_s11  }
  0xbd PF: > { %p413_p13 = scmp.ge.s32.totalorder %s614_s19, 2  ;;  %s295_s20 = sand.u32 1, %s586_s12  }
  0xbe   : > { %s296_s21 = scalar_lea.sflag [#allocation4], %s295_s20 }
  0xbf   : > { %p409_p0 = pnand %p413_p13, %p714_p12 }
  0xc1   : > { %p410_p1 = pneg %p409_p0 }
  0xc3   : > { %581 = dma.done.wait (%p410_p1), %s296_s21, 256  }
  0xc4   : > { %583 = vsyncadd (%p410_p1), %s296_s21, 4294967040  ;;  %s19_s19 = sadd.s32 1, %s614_s19   ;;  %s807_s25 = sld [smem:[#allocation10_spill]] }
  0xc5   : > { %p16_p2 = scmp.ge.s32.totalorder %s19_s19, 6   ;;  %s808_s28 = sld [smem:[#allocation8_spill]] }
  0xc6   : > { %s809_s29 = sld [smem:[#allocation9_spill]]  ;;  %s810_s12 = smov %s590_s13 }
  0xc7   : > { %s811_s13 = smov %s594_s14  ;;  %s813_s15 = smov %s606_s17 }
  0xc8   : > { %s814_s16 = smov %s610_s18  ;;  %18 = sbr.rel (!%p16_p2) target bundleno = 7 (0x7), region = 77 }
  0xca   : > { %s812_s14 = smov %s807_s25 }
  0xcb   : > { %s815_s17 = smov %s808_s28 }
  0xcc   : > { %s816_s18 = smov %s809_s29 }
  0xcd   :  { %302 = vsyncpa [#allocation3], 1 }
  0xce   :  { %304 = vsyncpa [#allocation3 + $0x1], 1 }
  0xcf   :  { %305 = vsyncpa [#allocation4], 1 }
  0xd0   :  { %307 = vsyncpa [#allocation4 + $0x1], 1 }

</bundles_post_ra>
